<compile_context>
chip_gen: v7x
topology: tpu7x:2x2x1
jax: 0.10.0
libtpu: 0.0.40
codegen_flags: <defaults>
</compile_context>

<pallas_src>
import functools

import jax
import jax.numpy as jnp
import numpy as np
from jax.experimental import pallas as pl
from jax.experimental.pallas import tpu as pltpu

_KERNELS = {
    "linear": [1 / 8, 3 / 8, 3 / 8, 1 / 8],
    "cubic": [-0.01171875, -0.03515625, 0.11328125, 0.43359375,
              0.43359375, 0.11328125, -0.03515625, -0.01171875],
    "lanczos3": [0.003689131001010537, 0.015056144446134567, -0.03399861603975296,
                 -0.066637322306633, 0.13550527393817902, 0.44638532400131226,
                 0.44638532400131226, 0.13550527393817902, -0.066637322306633,
                 -0.03399861603975296, 0.015056144446134567, 0.003689131001010537],
}

_NP_PAD = {"reflect": "reflect", "replicate": "edge", "circular": "wrap",
           "constant": "constant"}


def _upsample1d_kernel(x_ref, o_ref, *, taps, L, pad_amt, pad_mode):
    """x_ref: (R_tile, L) unpadded rows; o_ref: (R_tile, 2L)."""
    K = len(taps)
    x = x_ref[...]                          # keep input dtype (bf16 stays packed)
    rows = x_ref.shape[0]

    # ---- fused boundary halo (pad_amt samples per side), built in VMEM ----
    if pad_mode == "reflect":
        # pad_amt <= 3, so at most 3 narrow pieces per side (reversed columns).
        left = [x[:, pad_amt - i:pad_amt - i + 1] for i in range(pad_amt)]
        right = [x[:, L - 2 - i:L - 1 - i] for i in range(pad_amt)]
        pieces = left + [x] + right
    elif pad_mode == "replicate":
        pieces = [jnp.broadcast_to(x[:, 0:1], (rows, pad_amt)), x,
                  jnp.broadcast_to(x[:, L - 1:L], (rows, pad_amt))]
    elif pad_mode == "circular":
        pieces = [x[:, L - pad_amt:L], x, x[:, 0:pad_amt]]
    elif pad_mode == "constant":
        zeros = jnp.zeros((rows, pad_amt), x.dtype)
        pieces = [zeros, x, zeros]
    else:
        raise ValueError(f"unsupported pad_mode: {pad_mode}")
    x_pad = jnp.concatenate(pieces, axis=-1)            # (rows, L + K//2)

    # ---- polyphase FIR: each shifted slice (and its f32 upcast) is computed
    #      exactly once and shared between the even and odd phases ----
    y_even = None
    y_odd = None
    for j in range(K // 2 + 1):
        s = x_pad[:, j:j + L].astype(jnp.float32)       # one rotate + convert per j
        if j < K // 2:
            t = taps[K - 1 - 2 * j] * s
            y_even = t if y_even is None else y_even + t
        if j >= 1:
            t = taps[K - 2 * j] * s
            y_odd = t if y_odd is None else y_odd + t

    # Interleave phases -> (rows, 2L).  One in-VMEM relayout, hidden under the
    # HBM-bound store.
    # TODO(synk): for bf16 outputs, a bitcast pack (2xbf16 -> u32 slab) would replace
    # this XLU interleave with a cheap VPU pack; kept the generic path for all dtypes.
    y = jnp.stack([y_even, y_odd], axis=-1).reshape(rows, 2 * L)
    o_ref[...] = y.astype(o_ref.dtype)


def _round_down_to_8(n):
    return (n // 8) * 8


def _vmem_capacity_bytes():
    """Per-TensorCore VMEM capacity; conservative 64 MiB (v7x) if unqueryable."""
    try:
        cap = getattr(pltpu.get_tpu_info(), "vmem_capacity_bytes", None)
        if cap:
            return int(cap)
    except Exception:
        pass
    return 64 * 1024 * 1024


def upsample1d(x, kernel="linear", pad_mode="reflect", *, max_rows_per_block=None):
    """Pallas equivalent of Upsample1d(kernel, pad_mode).forward(x); x is (N, C, L)."""
    taps = [2.0 * float(v) for v in _KERNELS[kernel]]       # kernel_1d * 2 (buffer init)
    K = len(taps)
    pad = K // 2 - 1
    pad_amt = (pad + 1) // 2
    assert 2 * pad_amt == K // 2, "tap count must be a multiple of 4 (pad math)"

    N, C, L = x.shape
    if L <= pad_amt:
        raise ValueError("spatial length must exceed the pad width")

    R = N * C
    x2 = x.reshape(R, L)                                    # free, contiguous
    itemsize = jnp.dtype(x.dtype).itemsize

    # --- generation-aware VMEM budget & footprint model ---
    vmem_cap = _vmem_capacity_bytes()                       # 64 MiB v7x, 128 MiB v5e/v6e
    budget = min(vmem_cap // 2, 56 * 1024 * 1024)
    # Per-row bytes: double-buffered in (L) + out (2L) blocks, plus f32 temporaries
    # (x_pad, current shifted slice, two accumulators, interleave stack + cast ~ 10L).
    per_row_bytes = 6 * L * itemsize + (10 * L + K) * 4
    rows_fit = max(8, _round_down_to_8(budget // per_row_bytes))
    # TODO(synk): add an L-tiled (halo'd second grid axis) path for sequences so long
    # that even an 8-row tile exceeds the VMEM budget.

    # --- guarantee a multi-step grid so BlockSpec pipelining / both v7x cores engage ---
    if R >= 64:
        min_steps = 8
    elif R >= 16:
        min_steps = 2
    else:
        min_steps = 1

    if R < 8:
        r_tile = R                                          # full-extent block (legal)
    else:
        rows_steps = max(8, _round_down_to_8(R // min_steps))
        r_tile = max(8, min(rows_fit, rows_steps, 1024))
        if max_rows_per_block is not None:
            r_tile = max(8, min(r_tile, _round_down_to_8(int(max_rows_per_block))))
    grid = (pl.cdiv(R, r_tile),)                            # ragged last block is masked

    est_block_bytes = r_tile * per_row_bytes
    vmem_limit = int(min(vmem_cap, max(32 * 1024 * 1024, est_block_bytes * 3 // 2)))

    body = functools.partial(_upsample1d_kernel, taps=taps, L=L,
                             pad_amt=pad_amt, pad_mode=pad_mode)

    cost = pl.CostEstimate(
        flops=2 * R * L * K,                                # ~K mul+add per output sample
        transcendentals=0,
        bytes_accessed=R * L * itemsize + R * 2 * L * itemsize,
    )

    y2 = pl.pallas_call(
        body,
        out_shape=jax.ShapeDtypeStruct((R, 2 * L), x.dtype),
        grid=grid,
        in_specs=[pl.BlockSpec((r_tile, L), lambda i: (i, 0))],
        out_specs=pl.BlockSpec((r_tile, 2 * L), lambda i: (i, 0)),
        compiler_params=pltpu.CompilerParams(
            dimension_semantics=("parallel",),              # rows independent -> 2 TCs on v7x
            vmem_limit_bytes=vmem_limit,
        ),
        cost_estimate=cost,
    )(x2)
    return y2.reshape(N, C, 2 * L)


def _reference(x, kernel="linear", pad_mode="reflect"):
    """Independent numpy reference: zero-insert upsample + full convolution + crop."""
    taps = np.asarray(_KERNELS[kernel], dtype=np.float64) * 2.0
    K = taps.shape[0]
    pad = K // 2 - 1
    pad_amt = (pad + 1) // 2
    P = 2 * pad + 1                                         # conv_transpose1d padding
    xp = np.pad(np.asarray(x, dtype=np.float64),
                ((0, 0), (0, 0), (pad_amt, pad_amt)), mode=_NP_PAD[pad_mode])
    N, C, Lp = xp.shape
    L = x.shape[-1]
    out = np.zeros((N, C, 2 * L), np.float64)
    for n in range(N):
        for c in range(C):
            z = np.zeros(2 * (Lp - 1) + 1, np.float64)
            z[::2] = xp[n, c]
            full = np.convolve(z, taps, mode="full")
            out[n, c] = full[P:P + 2 * L]
    return out.astype(np.float32)


if __name__ == "__main__":
    key = jax.random.PRNGKey(0)
    x = jax.random.normal(key, (2, 4, 16), dtype=jnp.float32)     # (N, C, L)

    # Primary case (matches the module's default config).
    y = jax.block_until_ready(upsample1d(x, kernel="linear", pad_mode="reflect"))
    assert y.shape == (2, 4, 32), y.shape
    np.testing.assert_allclose(np.asarray(y),
                               _reference(np.asarray(x), "linear", "reflect"),
                               rtol=1e-5, atol=1e-5)

    # Tap-mapping / pad-mode coverage (cubic K=8, lanczos3 K=12, other pad modes).
    for kern, pm in [("cubic", "reflect"), ("lanczos3", "reflect"),
                     ("linear", "replicate"), ("linear", "circular"),
                     ("linear", "constant")]:
        yk = jax.block_until_ready(upsample1d(x, kernel=kern, pad_mode=pm))
        np.testing.assert_allclose(np.asarray(yk),
                                   _reference(np.asarray(x), kern, pm),
                                   rtol=1e-5, atol=1e-5, err_msg=f"{kern}/{pm}")

    # Multi-block (grid > 1) path: 24 rows in 8-row tiles.
    x2 = jax.random.normal(jax.random.PRNGKey(0), (3, 8, 64), dtype=jnp.float32)
    y2 = jax.block_until_ready(
        upsample1d(x2, kernel="cubic", pad_mode="reflect", max_rows_per_block=8))
    assert y2.shape == (3, 8, 128), y2.shape
    np.testing.assert_allclose(np.asarray(y2),
                               _reference(np.asarray(x2), "cubic", "reflect"),
                               rtol=1e-5, atol=1e-5)

    # Ragged grid path (R = 20 not a multiple of the 8-row tile; last block masked).
    x3 = jax.random.normal(jax.random.PRNGKey(0), (5, 4, 32), dtype=jnp.float32)
    y3 = jax.block_until_ready(
        upsample1d(x3, kernel="lanczos3", pad_mode="reflect", max_rows_per_block=8))
    assert y3.shape == (5, 4, 64), y3.shape
    np.testing.assert_allclose(np.asarray(y3),
                               _reference(np.asarray(x3), "lanczos3", "reflect"),
                               rtol=1e-5, atol=1e-5)

    print("KERNEL_OK")
</pallas_src>

<mosaic_0001>
module attributes {stable_mosaic.version = 11 : i64} {
  func.func @_upsample1d_kernel(%arg0: i32, %arg1: memref<8x16xf32, #tpu.memory_space<vmem>>, %arg2: memref<8x32xf32, #tpu.memory_space<vmem>>) attributes {dimension_semantics = [#tpu.dimension_semantics<parallel>], iteration_bounds = array<i64: 1>, scalar_prefetch = 0 : i64, scratch_operands = 0 : i64, tpu.core_type = #tpu.core_type<tc>, window_params = [{transform_indices = @transform_0, window_bounds = array<i64: 8, 16>}, {transform_indices = @transform_1, window_bounds = array<i64: 8, 32>}]} {
    %c0 = arith.constant 0 : index
    %c0_0 = arith.constant 0 : index
    %0 = vector.load %arg1[%c0, %c0_0] : memref<8x16xf32, #tpu.memory_space<vmem>>, vector<8x16xf32>
    %1 = vector.extract_strided_slice %0 {offsets = [0, 1], sizes = [8, 1], strides = [1, 1]} : vector<8x16xf32> to vector<8x1xf32>
    %2 = vector.extract_strided_slice %0 {offsets = [0, 14], sizes = [8, 1], strides = [1, 1]} : vector<8x16xf32> to vector<8x1xf32>
    %3 = tpu.concatenate %1, %0, %2 in 1 : vector<8x1xf32>, vector<8x16xf32>, vector<8x1xf32> -> vector<8x18xf32>
    %4 = vector.extract_strided_slice %3 {offsets = [0, 0], sizes = [8, 16], strides = [1, 1]} : vector<8x18xf32> to vector<8x16xf32>
    %cst = arith.constant 2.500000e-01 : f32
    %5 = vector.broadcast %cst : f32 to vector<8x16xf32>
    %6 = arith.mulf %5, %4 : vector<8x16xf32>
    %7 = vector.extract_strided_slice %3 {offsets = [0, 1], sizes = [8, 16], strides = [1, 1]} : vector<8x18xf32> to vector<8x16xf32>
    %cst_1 = arith.constant 7.500000e-01 : f32
    %8 = vector.broadcast %cst_1 : f32 to vector<8x16xf32>
    %9 = arith.mulf %8, %7 : vector<8x16xf32>
    %10 = arith.addf %6, %9 : vector<8x16xf32>
    %cst_2 = arith.constant 7.500000e-01 : f32
    %11 = vector.broadcast %cst_2 : f32 to vector<8x16xf32>
    %12 = arith.mulf %11, %7 : vector<8x16xf32>
    %13 = vector.extract_strided_slice %3 {offsets = [0, 2], sizes = [8, 16], strides = [1, 1]} : vector<8x18xf32> to vector<8x16xf32>
    %cst_3 = arith.constant 2.500000e-01 : f32
    %14 = vector.broadcast %cst_3 : f32 to vector<8x16xf32>
    %15 = arith.mulf %14, %13 : vector<8x16xf32>
    %16 = arith.addf %12, %15 : vector<8x16xf32>
    %17 = vector.shape_cast %10 : vector<8x16xf32> to vector<8x16x1xf32>
    %18 = vector.shape_cast %16 : vector<8x16xf32> to vector<8x16x1xf32>
    %19 = tpu.concatenate %17, %18 in 2 : vector<8x16x1xf32>, vector<8x16x1xf32> -> vector<8x16x2xf32>
    %20 = vector.shape_cast %19 : vector<8x16x2xf32> to vector<8x32xf32>
    %c0_4 = arith.constant 0 : index
    %c0_5 = arith.constant 0 : index
    %21 = vector.load %arg2[%c0_4, %c0_5] : memref<8x32xf32, #tpu.memory_space<vmem>>, vector<8x32xf32>
    tpu.vector_store %arg2[%c0_4, %c0_5], %20 {strides = array<i32>} : memref<8x32xf32, #tpu.memory_space<vmem>>, vector<8x32xf32>,
    return
  }
  func.func @transform_0(%arg0: i32) -> (i32, i32) {
    %c0_i32 = arith.constant 0 : i32
    %c0_i32_0 = arith.constant 0 : i32
    return %arg0, %c0_i32 : i32, i32
  }
  func.func @transform_1(%arg0: i32) -> (i32, i32) {
    %c0_i32 = arith.constant 0 : i32
    %c0_i32_0 = arith.constant 0 : i32
    return %arg0, %c0_i32 : i32, i32
  }
}

</mosaic_0001>

<bundles_post_ra>
// kernel: tpu_custom_call.1
= control target key start
LH: loop header
LB: loop body
LE: loop exit
PB: predicated region body
PF: predicated region fallthrough
CT: control target
= control target key end

     0   :  { %6 = vsyncpa [#allocation3], 0  ;;  %s829_s0 = inlined_call_operand.hbm [shape: f32[8,16], index: 0, kind: input, shape index: {}]   ;;  %s830_s1 = inlined_call_operand.hbm [shape: f32[8,32], index: 1, kind: output, shape index: {}]  }
   0x1   :  { %7 = vsyncpa [#allocation4], 0  ;;  %s697_s6 = smov [#allocation2]   ;;  %s649_s10 = scalar_lea.hbm %s829_s0, 128 }
   0x2   :  { %s14_s7 = sshll.u32 %s697_s6, 4  ;;  %p650_p0 = scmp.ne.s32.totalorder %s829_s0, %s649_s10  ;;  %s15_s7 = int_to_ptr.vmem [resolvable:$true] %s14_s7 }
   0x3   :  { %p653_p1 = scmp.lt.u32.totalorder %s649_s10, %s829_s0 }
   0x5   :  { %p655_p2 = pnand %p653_p1, %p650_p0 }
   0x7   :  { %658 = shalt.err (!%p655_p2)
}
   0x8   :  { %s659_s15 = scalar_lea.vmem %s15_s7, 128  ;;  %p664_p4 = scmp.lt.s32.totalorder %s15_s7, %s15_s7 }
   0x9   :  { %p660_p3 = scmp.ne.s32.totalorder %s15_s7, %s659_s15  ;;  %p665_p5 = scmp.lt.s32.totalorder %s659_s15, %s659_s15 }
   0xb   :  { %p666_p6 = por %p665_p5, %p664_p4 }
   0xd   :  { %p667_p7 = pnand %p666_p6, %p660_p3 }
   0xf   :  { %670 = shalt.err (!%p667_p7)
}
  0x10   :  { %17 = dma.hbm_to_vmem [thread:$0]  %s829_s0, 128, %s15_s7, [#allocation3]  }
  0x11   :  { %693 = dma.done.wait [#allocation3], 128  }
  0x12   :  { %694 = vsyncadd [#allocation3], 4294967168  ;;  %v21_v0 = vld [vmem:[#allocation2] sm:$0xff]  ;;  %s698_s18 = smov 127   ;;  %s699_s19 = smov 3   ;;  %vm32_vm0 = vcmask 7168   ;;  %v48_v8 = vlaneseq }
  0x13   :  { %23 = vrot.lane.b32.xlu0 %v21_v0, %s698_s18  ;;  %29 = vrot.lane.b32.xlu1 %v21_v0, %s699_s19  ;;  %s700_s20 = smov 1   ;;  %vm34_vm1 = vcmask 138240   ;;  %v701_v46 = vmov 1983009808   ;;  %v702_v51 = vmov 1934713408  }
  0x14   :  { %v742_v9 = vshrl.u32 %v48_v8, 7  ;;  %v251_v47 = vunpack.c.l.s4 %v701_v46  ;;  %v315_v52 = vunpack.c.l.s4 %v702_v51  ;;  %s703_s0 = smov 4   ;;  %s704_s21 = smov 2   ;;  %vm580_vm2 = vcmask 15360  }
  0x15   :  { %s705_s22 = smov 8   ;;  %s706_s23 = smov 6   ;;  %vm582_vm3 = vcmask 31744   ;;  %vm584_vm4 = vcmask 48128   ;;  %vm586_vm5 = vcmask 64512   ;;  %vm588_vm6 = vcmask 80896  }
  0x16   :  { %v61_v10 = vsub.s32 1, %v742_v9  ;;  %v50_v11 = vsub.s32 0, %v742_v9  ;;  %v83_v16 = vsub.s32 3, %v742_v9  ;;  %v72_v17 = vsub.s32 2, %v742_v9  ;;  %s707_s24 = smov 12   ;;  %s708_s25 = smov 10  }
  0x17   :  { %26 = vrot.lane.b32.xlu0 %v21_v0, %s700_s20  ;;  %v105_v20 = vsub.s32 5, %v742_v9  ;;  %v94_v21 = vsub.s32 4, %v742_v9  ;;  %v127_v24 = vsub.s32 7, %v742_v9  ;;  %v116_v25 = vsub.s32 6, %v742_v9  ;;  %s709_s26 = smov 14   ;;  %s710_s27 = smov 18  }
  0x18   :  { %v252_v50 = vunpack.c.0.s8 %v251_v47  ;;  %v316_v62 = vunpack.c.0.s8 %v315_v52  ;;  %s711_s28 = smov 16   ;;  %s712_s29 = smov 22   ;;  %vm590_vm7 = vcmask 97280   ;;  %vm592_vm8 = vcmask 113664  }
  0x19   :  { %s713_s30 = smov 20   ;;  %s714_s2 = smov 26   ;;  %vm594_vm9 = vcmask 130048   ;;  %vm596_vm10 = vcmask 146432   ;;  %vm598_vm11 = vcmask 162816   ;;  %vm600_vm12 = vcmask 179200  }
  0x1a   :  { %v757_v59 = vsub.s32 %v252_v50, %v742_v9  ;;  %s715_s3 = smov 24   ;;  %s716_s4 = smov 30   ;;  %vm602_vm13 = vcmask 195584   ;;  %vm604_vm14 = vcmask 211968   ;;  %vm606_vm15 = vcmask 228352  }
  0x1b   :  { %s717_s5 = smov 28   ;;  %s718_s6 = smov [#allocation5]  }
  0x1c   :  { %s618_s7 = sshll.u32 %s718_s6, 4  ;;  %s619_s7 = int_to_ptr.vmem [resolvable:$true] %s618_s7 }
  0x1d   :  { %s671_s8 = scalar_lea.vmem %s619_s7, 128  ;;  %p676_p9 = scmp.lt.s32.totalorder %s619_s7, %s619_s7 }
  0x1e   :  { %p672_p8 = scmp.ne.s32.totalorder %s619_s7, %s671_s8  ;;  %p677_p10 = scmp.lt.s32.totalorder %s671_s8, %s671_s8 }
  0x20   :  { %p678_p11 = por %p677_p10, %p676_p9 }
  0x22   :  { %p679_p12 = pnand %p678_p11, %p672_p8 }
  0x85   :  { %v24_v1 = vpop.permute.xlu0 %23  ;;  %v30_v2 = vpop.permute.xlu1 %29 }
  0x89   :  { %v27_v3 = vpop.permute.xlu0 %26 }
  0x8a   :  { %v33_v4 = vsel %vm32_vm0, %v24_v1, %v27_v3 }
  0x8b   :  { %v35_v5 = vsel %vm34_vm1, %v33_v4, %v30_v2  ;;  %vm610_vm1 = vcmask 261120  }
  0x8c   :  { %v36_v6 = vmul.f32 0.25, %v35_v5  ;;  %v37_v7 = vmul.f32 0.75, %v35_v5  ;;  %v762_v5 = vsub.s32 %v316_v62, %v742_v9 }
  0x8e   :  { %39 = vrot.lane.b32.xlu1 %v37_v7, %s698_s18  ;;  %44 = vrot.lane.b32.xlu0 %v36_v6, %s698_s18 }
 0x100   :  { %v40_v12 = vpop.permute.xlu1 %39  ;;  %v45_v26 = vpop.permute.xlu0 %44 }
 0x101   :  { %v42_v13 = vadd.f32 %v40_v12, %v36_v6  ;;  %v47_v27 = vadd.f32 %v45_v26, %v37_v7 }
 0x103   :  { %v62_v14 = vrot.slane %v42_v13, %v61_v10  ;;  %v51_v15 = vrot.slane %v42_v13, %v50_v11  ;;  %v84_v18 = vrot.slane %v42_v13, %v83_v16  ;;  %v73_v19 = vrot.slane %v42_v13, %v72_v17 }
 0x104   :  { %v106_v22 = vrot.slane %v42_v13, %v105_v20  ;;  %v95_v23 = vrot.slane %v42_v13, %v94_v21  ;;  %v128_v28 = vrot.slane %v42_v13, %v127_v24  ;;  %v117_v29 = vrot.slane %v42_v13, %v116_v25 }
 0x105   :  { %64 = vbcast.lane.b32.xlu0 %v62_v14, 256  ;;  %53 = vbcast.lane.b32.xlu1 %v51_v15, 256  ;;  %v151_v30 = vrot.slane %v47_v27, %v61_v10  ;;  %v139_v31 = vrot.slane %v47_v27, %v50_v11  ;;  %v175_v32 = vrot.slane %v47_v27, %v83_v16 }
 0x106   :  { %v163_v33 = vrot.slane %v47_v27, %v72_v17  ;;  %v199_v34 = vrot.slane %v47_v27, %v105_v20  ;;  %v187_v35 = vrot.slane %v47_v27, %v94_v21  ;;  %v223_v36 = vrot.slane %v47_v27, %v127_v24 }
 0x107   :  { %v211_v37 = vrot.slane %v47_v27, %v116_v25 }
 0x109   :  { %86 = vbcast.lane.b32.xlu0 %v84_v18, 256  ;;  %75 = vbcast.lane.b32.xlu1 %v73_v19, 256 }
 0x10d   :  { %108 = vbcast.lane.b32.xlu0 %v106_v22, 256  ;;  %97 = vbcast.lane.b32.xlu1 %v95_v23, 256 }
 0x111   :  { %130 = vbcast.lane.b32.xlu0 %v128_v28, 256  ;;  %119 = vbcast.lane.b32.xlu1 %v117_v29, 256 }
 0x115   :  { %154 = vbcast.lane.b32.xlu0 %v151_v30, 257  ;;  %142 = vbcast.lane.b32.xlu1 %v139_v31, 257 }
 0x119   :  { %178 = vbcast.lane.b32.xlu0 %v175_v32, 257  ;;  %166 = vbcast.lane.b32.xlu1 %v163_v33, 257 }
 0x11d   :  { %202 = vbcast.lane.b32.xlu0 %v199_v34, 257  ;;  %190 = vbcast.lane.b32.xlu1 %v187_v35, 257 }
 0x121   :  { %226 = vbcast.lane.b32.xlu0 %v223_v36, 257  ;;  %214 = vbcast.lane.b32.xlu1 %v211_v37, 257 }
 0x125   :  { %68 = vbcast.lane.b32.xlu0 %v62_v14, 264  ;;  %57 = vbcast.lane.b32.xlu1 %v51_v15, 264 }
 0x129   :  { %90 = vbcast.lane.b32.xlu0 %v84_v18, 264  ;;  %79 = vbcast.lane.b32.xlu1 %v73_v19, 264 }
 0x12d   :  { %112 = vbcast.lane.b32.xlu0 %v106_v22, 264  ;;  %101 = vbcast.lane.b32.xlu1 %v95_v23, 264 }
 0x131   :  { %134 = vbcast.lane.b32.xlu0 %v128_v28, 264  ;;  %123 = vbcast.lane.b32.xlu1 %v117_v29, 264 }
 0x135   :  { %158 = vbcast.lane.b32.xlu0 %v151_v30, 265  ;;  %146 = vbcast.lane.b32.xlu1 %v139_v31, 265 }
 0x139   :  { %182 = vbcast.lane.b32.xlu0 %v175_v32, 265  ;;  %170 = vbcast.lane.b32.xlu1 %v163_v33, 265 }
 0x13d   :  { %206 = vbcast.lane.b32.xlu0 %v199_v34, 265  ;;  %194 = vbcast.lane.b32.xlu1 %v187_v35, 265 }
 0x141   :  { %230 = vbcast.lane.b32.xlu0 %v223_v36, 265  ;;  %218 = vbcast.lane.b32.xlu1 %v211_v37, 265 }
 0x177   :  { %v65_v38 = vpop.permute.xlu0 %64  ;;  %v54_v39 = vpop.permute.xlu1 %53 }
 0x17b   :  { %v87_v40 = vpop.permute.xlu0 %86  ;;  %v76_v41 = vpop.permute.xlu1 %75 }
 0x17f   :  { %v109_v42 = vpop.permute.xlu0 %108  ;;  %v98_v43 = vpop.permute.xlu1 %97 }
 0x183   :  { %v131_v44 = vpop.permute.xlu0 %130  ;;  %v120_v45 = vpop.permute.xlu1 %119 }
 0x187   :  { %v155_v48 = vpop.permute.xlu0 %154  ;;  %v143_v49 = vpop.permute.xlu1 %142 }
 0x188   :  { %v234_v57 = vsel %vm32_vm0, %v65_v38, %v155_v48  ;;  %v232_v58 = vsel %vm32_vm0, %v54_v39, %v143_v49 }
 0x18b   :  { %v179_v53 = vpop.permute.xlu0 %178  ;;  %v167_v54 = vpop.permute.xlu1 %166 }
 0x18c   :  { %v238_v55 = vsel %vm32_vm0, %v87_v40, %v179_v53  ;;  %v236_v56 = vsel %vm32_vm0, %v76_v41, %v167_v54 }
 0x18d   :  { %v264_v60 = vcombine.low %v234_v57, %v238_v55  ;;  %v248_v61 = vcombine.low %v232_v58, %v236_v56  ;;  %v265_v1 = vcombine.high %v234_v57, %v238_v55  ;;  %v249_v3 = vcombine.high %v232_v58, %v236_v56 }
 0x18f   :  { %v203_v63 = vpop.permute.xlu0 %202  ;;  %v191_v0 = vpop.permute.xlu1 %190  ;;  %v272_v2 = vrot.slane %v264_v60, %v757_v59  ;;  %v256_v4 = vrot.slane %v248_v61, %v757_v59  ;;  %v279_v17 = vrot.slane %v265_v1, %v757_v59  ;;  %v263_v18 = vrot.slane %v249_v3, %v757_v59 }
 0x190   :  { %v242_v8 = vsel %vm32_vm0, %v109_v42, %v203_v63  ;;  %v240_v10 = vsel %vm32_vm0, %v98_v43, %v191_v0 }
 0x191   :  { %v312_v9 = vcombine.low %v256_v4, %v272_v2  ;;  %v313_v19 = vcombine.high %v256_v4, %v272_v2  ;;  %v328_v29 = vcombine.low %v263_v18, %v279_v17  ;;  %v329_v41 = vcombine.high %v263_v18, %v279_v17 }
 0x193   :  { %v227_v6 = vpop.permute.xlu0 %226  ;;  %v215_v7 = vpop.permute.xlu1 %214  ;;  %v327_v32 = vrot.slane %v313_v19, %v762_v5  ;;  %v777_v34 = vrot.slane %v312_v9, %v762_v5  ;;  %v343_v50 = vrot.slane %v329_v41, %v762_v5 }
 0x194   :  { %v246_v11 = vsel %vm32_vm0, %v131_v44, %v227_v6  ;;  %v244_v12 = vsel %vm32_vm0, %v120_v45, %v215_v7  ;;  %v336_v44 = vrot.slane %v328_v29, %v762_v5 }
 0x195   :  { %v296_v13 = vcombine.low %v242_v8, %v246_v11  ;;  %v297_v14 = vcombine.high %v242_v8, %v246_v11  ;;  %v280_v15 = vcombine.low %v240_v10, %v244_v12  ;;  %v281_v16 = vcombine.high %v240_v10, %v244_v12 }
 0x197   :  { %v304_v20 = vrot.slane %v296_v13, %v757_v59  ;;  %v311_v21 = vrot.slane %v297_v14, %v757_v59  ;;  %v288_v22 = vrot.slane %v280_v15, %v757_v59  ;;  %v295_v23 = vrot.slane %v281_v16, %v757_v59  ;;  %v69_v24 = vpop.permute.xlu0 %68  ;;  %v58_v25 = vpop.permute.xlu1 %57 }
 0x199   :  { %v344_v26 = vcombine.low %v288_v22, %v304_v20  ;;  %v345_v27 = vcombine.high %v288_v22, %v304_v20  ;;  %v360_v28 = vcombine.low %v295_v23, %v311_v21  ;;  %v361_v36 = vcombine.high %v295_v23, %v311_v21 }
 0x19b   :  { %v91_v30 = vpop.permute.xlu0 %90  ;;  %v80_v31 = vpop.permute.xlu1 %79  ;;  %v359_v33 = vrot.slane %v345_v27, %v762_v5  ;;  %v780_v35 = vrot.slane %v344_v26, %v762_v5  ;;  %v368_v39 = vrot.slane %v360_v28, %v762_v5  ;;  %v375_v47 = vrot.slane %v361_v36, %v762_v5 }
 0x19d   :  { %v378_v37 = vcombine.low %v327_v32, %v359_v33  ;;  %v377_v38 = vcombine.high %v777_v34, %v780_v35  ;;  %v376_v40 = vcombine.low %v777_v34, %v780_v35  ;;  %v380_v45 = vcombine.low %v336_v44, %v368_v39 }
 0x19e   :  { %v379_v46 = vcombine.high %v327_v32, %v359_v33  ;;  %v382_v51 = vcombine.low %v343_v50, %v375_v47  ;;  %v381_v52 = vcombine.high %v336_v44, %v368_v39  ;;  %v383_v55 = vcombine.high %v343_v50, %v375_v47 }
 0x19f   :  { %v113_v42 = vpop.permute.xlu0 %112  ;;  %525 = vrot.lane.b32.xlu0 %v378_v37, %s703_s0  ;;  %521 = vrot.lane.b32.xlu1 %v377_v38, %s704_s21  ;;  %v102_v43 = vpop.permute.xlu1 %101 }
 0x1a3   :  { %v135_v48 = vpop.permute.xlu0 %134  ;;  %533 = vrot.lane.b32.xlu0 %v380_v45, %s705_s22  ;;  %529 = vrot.lane.b32.xlu1 %v379_v46, %s706_s23  ;;  %v124_v49 = vpop.permute.xlu1 %123 }
 0x1a7   :  { %v159_v53 = vpop.permute.xlu0 %158  ;;  %541 = vrot.lane.b32.xlu0 %v382_v51, %s707_s24  ;;  %537 = vrot.lane.b32.xlu1 %v381_v52, %s708_s25  ;;  %v147_v54 = vpop.permute.xlu1 %146 }
 0x1a8   :  { %v235_v61 = vsel %vm32_vm0, %v69_v24, %v159_v53  ;;  %v233_v62 = vsel %vm32_vm0, %v58_v25, %v147_v54 }
 0x1ab   :  { %v183_v56 = vpop.permute.xlu0 %182  ;;  %545 = vrot.lane.b32.xlu1 %v383_v55, %s709_s26  ;;  %v171_v57 = vpop.permute.xlu1 %170 }
 0x1ac   :  { %v239_v58 = vsel %vm32_vm0, %v91_v30, %v183_v56  ;;  %v237_v60 = vsel %vm32_vm0, %v80_v31, %v171_v57 }
 0x1ad   :  { %v400_v63 = vcombine.low %v235_v61, %v239_v58  ;;  %v384_v0 = vcombine.low %v233_v62, %v237_v60  ;;  %v401_v17 = vcombine.high %v235_v61, %v239_v58  ;;  %v385_v18 = vcombine.high %v233_v62, %v237_v60 }
 0x1af   :  { %v207_v1 = vpop.permute.xlu0 %206  ;;  %v195_v2 = vpop.permute.xlu1 %194  ;;  %v408_v3 = vrot.slane %v400_v63, %v757_v59  ;;  %v392_v4 = vrot.slane %v384_v0, %v757_v59  ;;  %v415_v25 = vrot.slane %v401_v17, %v757_v59  ;;  %v399_v26 = vrot.slane %v385_v18, %v757_v59 }
 0x1b0   :  { %v243_v8 = vsel %vm32_vm0, %v113_v42, %v207_v1  ;;  %v241_v10 = vsel %vm32_vm0, %v102_v43, %v195_v2 }
 0x1b1   :  { %v448_v9 = vcombine.low %v392_v4, %v408_v3  ;;  %v449_v27 = vcombine.high %v392_v4, %v408_v3  ;;  %v464_v36 = vcombine.low %v399_v26, %v415_v25  ;;  %v465_v42 = vcombine.high %v399_v26, %v415_v25 }
 0x1b3   :  { %v231_v6 = vpop.permute.xlu0 %230  ;;  %v219_v7 = vpop.permute.xlu1 %218  ;;  %v456_v28 = vrot.slane %v448_v9, %v762_v5  ;;  %v463_v37 = vrot.slane %v449_v27, %v762_v5  ;;  %v472_v43 = vrot.slane %v464_v36, %v762_v5  ;;  %v479_v47 = vrot.slane %v465_v42, %v762_v5 }
 0x1b4   :  { %v247_v11 = vsel %vm32_vm0, %v135_v48, %v231_v6  ;;  %v245_v12 = vsel %vm32_vm0, %v124_v49, %v219_v7  ;;  %vm608_vm0 = vcmask 244736  }
 0x1b5   :  { %v432_v13 = vcombine.low %v243_v8, %v247_v11  ;;  %v433_v14 = vcombine.high %v243_v8, %v247_v11  ;;  %v416_v15 = vcombine.low %v241_v10, %v245_v12  ;;  %v417_v16 = vcombine.high %v241_v10, %v245_v12 }
 0x1b7   :  { %v440_v19 = vrot.slane %v432_v13, %v757_v59  ;;  %v424_v20 = vrot.slane %v416_v15, %v757_v59  ;;  %v447_v21 = vrot.slane %v433_v14, %v757_v59  ;;  %v431_v22 = vrot.slane %v417_v16, %v757_v59 }
 0x1b9   :  { %v480_v23 = vcombine.low %v424_v20, %v440_v19  ;;  %v481_v24 = vcombine.high %v424_v20, %v440_v19  ;;  %v496_v30 = vcombine.low %v431_v22, %v447_v21  ;;  %v497_v38 = vcombine.high %v431_v22, %v447_v21 }
 0x1bb   :  { %v488_v29 = vrot.slane %v480_v23, %v762_v5  ;;  %v495_v33 = vrot.slane %v481_v24, %v762_v5  ;;  %v504_v41 = vrot.slane %v496_v30, %v762_v5  ;;  %v511_v46 = vrot.slane %v497_v38, %v762_v5 }
 0x1bd   :  { %v513_v31 = vcombine.high %v456_v28, %v488_v29  ;;  %v512_v32 = vcombine.low %v456_v28, %v488_v29  ;;  %v515_v39 = vcombine.high %v463_v37, %v495_v33  ;;  %v514_v59 = vcombine.low %v463_v37, %v495_v33 }
 0x1be   :  { %v517_v44 = vcombine.high %v472_v43, %v504_v41  ;;  %v516_v45 = vcombine.low %v472_v43, %v504_v41  ;;  %v519_v48 = vcombine.high %v479_v47, %v511_v46  ;;  %v518_v49 = vcombine.low %v479_v47, %v511_v46 }
 0x1bf   :  { %553 = vrot.lane.b32.xlu1 %v513_v31, %s710_s27  ;;  %549 = vrot.lane.b32.xlu0 %v512_v32, %s711_s28 }
 0x1c3   :  { %561 = vrot.lane.b32.xlu1 %v515_v39, %s712_s29  ;;  %557 = vrot.lane.b32.xlu0 %v514_v59, %s713_s30 }
 0x1c7   :  { %569 = vrot.lane.b32.xlu1 %v517_v44, %s714_s2  ;;  %565 = vrot.lane.b32.xlu0 %v516_v45, %s715_s3 }
 0x1cb   :  { %577 = vrot.lane.b32.xlu1 %v519_v48, %s716_s4  ;;  %573 = vrot.lane.b32.xlu0 %v518_v49, %s717_s5 }
 0x211   :  { %v522_v50 = vpop.permute.xlu1 %521  ;;  %v526_v51 = vpop.permute.xlu0 %525 }
 0x212   :  { %v581_v53 = vsel %vm580_vm2, %v376_v40, %v522_v50 }
 0x213   :  { %v583_v56 = vsel %vm582_vm3, %v581_v53, %v526_v51 }
 0x215   :  { %v530_v52 = vpop.permute.xlu1 %529  ;;  %v534_v54 = vpop.permute.xlu0 %533 }
 0x216   :  { %v585_v5 = vsel %vm584_vm4, %v583_v56, %v530_v52 }
 0x217   :  { %v587_v57 = vsel %vm586_vm5, %v585_v5, %v534_v54 }
 0x219   :  { %v538_v55 = vpop.permute.xlu1 %537  ;;  %v542_v58 = vpop.permute.xlu0 %541 }
 0x21a   :  { %v589_v60 = vsel %vm588_vm6, %v587_v57, %v538_v55 }
 0x21b   :  { %v591_v62 = vsel %vm590_vm7, %v589_v60, %v542_v58 }
 0x21d   :  { %v546_v61 = vpop.permute.xlu1 %545 }
 0x21e   :  { %v593_v63 = vsel %vm592_vm8, %v591_v62, %v546_v61 }
 0x231   :  { %v550_v0 = vpop.permute.xlu0 %549  ;;  %v554_v34 = vpop.permute.xlu1 %553 }
 0x232   :  { %v595_v35 = vsel %vm594_vm9, %v593_v63, %v550_v0 }
 0x233   :  { %v597_v40 = vsel %vm596_vm10, %v595_v35, %v554_v34 }
 0x235   :  { %v558_v1 = vpop.permute.xlu0 %557  ;;  %v562_v2 = vpop.permute.xlu1 %561 }
 0x236   :  { %v599_v3 = vsel %vm598_vm11, %v597_v40, %v558_v1 }
 0x237   :  { %v601_v4 = vsel %vm600_vm12, %v599_v3, %v562_v2 }
 0x239   :  { %v566_v6 = vpop.permute.xlu0 %565  ;;  %v570_v7 = vpop.permute.xlu1 %569 }
 0x23a   :  { %v603_v8 = vsel %vm602_vm13, %v601_v4, %v566_v6 }
 0x23b   :  { %v605_v10 = vsel %vm604_vm14, %v603_v8, %v570_v7 }
 0x23d   :  { %v574_v11 = vpop.permute.xlu0 %573  ;;  %v578_v12 = vpop.permute.xlu1 %577 }
 0x23e   :  { %v607_v13 = vsel %vm606_vm15, %v605_v10, %v574_v11 }
 0x23f   :  { %v609_v14 = vsel %vm608_vm0, %v607_v13, %v578_v12 }
 0x240   :  { %611 = vst.msk [vmem:[#allocation5] sm:$0xff] %vm610_vm1, %v609_v14 }
 0x241   :  { %682 = shalt.err (!%p679_p12)
}
 0x242   :  { %s683_s11 = scalar_lea.hbm %s830_s1, 128 }
 0x243   :  { %p684_p13 = scmp.ne.s32.totalorder %s830_s1, %s683_s11  ;;  %p687_p0 = scmp.lt.u32.totalorder %s683_s11, %s830_s1 }
 0x245   :  { %p689_p1 = pnand %p687_p0, %p684_p13 }
 0x247   :  { %692 = shalt.err (!%p689_p1)
}
 0x248   :  { %621 = dma.vmem_to_hbm [thread:$0]  %s619_s7, 128, %s830_s1, [#allocation4]  }
 0x249   :  { %695 = dma.done.wait [#allocation4], 128  }
 0x24a   :  { %696 = vsyncadd [#allocation4], 4294967168 }
 0x24b   :  { %625 = vsyncpa [#allocation3], 1 }
 0x24c   :  { %626 = vsyncpa [#allocation4], 1 }

</bundles_post_ra>
